<compile_context>
chip_gen: v6e
topology: v6e:2x2x1
jax: 0.10.0
libtpu: 0.0.40
codegen_flags: <defaults>
</compile_context>

<pallas_src>
import functools

import jax
import jax.numpy as jnp
from jax.experimental import pallas as pl
from jax.experimental.pallas import tpu as pltpu

_VMEM_LIMIT = 48 * 1024 * 1024  # safe on v5e/v6e (128 MiB) and v7x (64 MiB)


def _round_up(x, m):
    return (x + m - 1) // m * m


# ---------------------------------------------------------------------------
# Pallas kernels
# ---------------------------------------------------------------------------
def _matmul_bias_act_kernel(p_ref, w_ref, b_ref, o_ref, acc_ref, *, apply_relu):
    """Tiled (patches @ W_bnfolded) + bias, optional ReLU.  K is grid axis 2."""
    @pl.when(pl.program_id(2) == 0)
    def _():
        acc_ref[...] = jnp.zeros_like(acc_ref)

    acc_ref[...] += jnp.dot(p_ref[...], w_ref[...],
                            preferred_element_type=jnp.float32)

    @pl.when(pl.program_id(2) == pl.num_programs(2) - 1)
    def _():
        y = acc_ref[...] + b_ref[...]
        if apply_relu:
            y = jnp.maximum(y, 0.0)
        o_ref[...] = y.astype(o_ref.dtype)


def _se_gate_residual(out2, sc, fc1w_ref, fc1b_ref, fc2w_ref, fc2b_ref, o_ref,
                      inv_hw):
    """Shared SE epilogue.  out2/sc are (HW, Cp) fp32."""
    # global average pool over spatial positions -> (1, Cp)
    pooled = jnp.sum(out2, axis=0, keepdims=True) * inv_hw
    # fc1 (1x1 conv) + ReLU -> (1, C16p)
    h = jnp.dot(pooled.astype(jnp.bfloat16), fc1w_ref[...],
                preferred_element_type=jnp.float32) + fc1b_ref[...]
    h = jnp.maximum(h, 0.0)
    # fc2 (1x1 conv) + sigmoid -> (1, Cp)
    g = jnp.dot(h.astype(jnp.bfloat16), fc2w_ref[...],
                preferred_element_type=jnp.float32) + fc2b_ref[...]
    g = jax.nn.sigmoid(g)
    # channel gate, residual add, final ReLU (fp32 epilogue: safe on v5e VPU)
    o_ref[0] = jnp.maximum(out2 * g + sc, 0.0)


def _se_residual_proj_kernel(out2_ref, xs_ref, wsc_ref, bsc_ref,
                             fc1w_ref, fc1b_ref, fc2w_ref, fc2b_ref, o_ref, *,
                             inv_hw):
    """SE + residual where the 1x1 projection shortcut (+BN) is fused in."""
    out2 = out2_ref[0].astype(jnp.float32)
    sc = jnp.dot(xs_ref[0], wsc_ref[...],
                 preferred_element_type=jnp.float32) + bsc_ref[...]
    _se_gate_residual(out2, sc, fc1w_ref, fc1b_ref, fc2w_ref, fc2b_ref, o_ref,
                      inv_hw)


def _se_residual_id_kernel(out2_ref, sc_ref,
                           fc1w_ref, fc1b_ref, fc2w_ref, fc2b_ref, o_ref, *,
                           inv_hw):
    """SE + residual with identity shortcut (sc already in bf16)."""
    out2 = out2_ref[0].astype(jnp.float32)
    sc = sc_ref[0].astype(jnp.float32)
    _se_gate_residual(out2, sc, fc1w_ref, fc1b_ref, fc2w_ref, fc2b_ref, o_ref,
                      inv_hw)


# ---------------------------------------------------------------------------
# Pallas-call wrappers
# ---------------------------------------------------------------------------
def matmul_bias_act(patches, w, bias, *, apply_relu, out_dtype=jnp.bfloat16,
                    keep_cout_pad=False):
    """bf16 tiled matmul + per-channel bias (+ReLU).  Lane-dense (128) Cout."""
    M, K = patches.shape
    Cout = w.shape[1]

    tn = 128
    tk = _round_up(K, 128)
    if tk > 1024:
        tk = 512
    tm = _round_up(M, 8)
    if tm > 512:
        tm = 512

    Mp, Kp, Np = _round_up(M, tm), _round_up(K, tk), _round_up(Cout, tn)

    p = jnp.pad(patches.astype(jnp.bfloat16), ((0, Mp - M), (0, Kp - K)))
    wp = jnp.pad(w.astype(jnp.bfloat16), ((0, Kp - K), (0, Np - Cout)))
    bp = jnp.pad(bias.astype(jnp.float32).reshape(1, Cout),
                 ((0, 0), (0, Np - Cout)))

    grid = (Mp // tm, Np // tn, Kp // tk)
    kernel = functools.partial(_matmul_bias_act_kernel, apply_relu=apply_relu)

    cost = pl.CostEstimate(
        flops=2 * Mp * Kp * Np,
        transcendentals=0,
        bytes_accessed=2 * (Mp * Kp + Kp * Np) + Mp * Np * jnp.dtype(out_dtype).itemsize,
    )

    y = pl.pallas_call(
        kernel,
        out_shape=jax.ShapeDtypeStruct((Mp, Np), out_dtype),
        grid=grid,
        in_specs=[
            pl.BlockSpec((tm, tk), lambda i, j, k: (i, k)),
            pl.BlockSpec((tk, tn), lambda i, j, k: (k, j)),
            pl.BlockSpec((1, tn), lambda i, j, k: (0, j)),   # bias: j-only
        ],
        out_specs=pl.BlockSpec((tm, tn), lambda i, j, k: (i, j)),
        scratch_shapes=[pltpu.VMEM((tm, tn), jnp.float32)],
        compiler_params=pltpu.CompilerParams(
            dimension_semantics=("parallel", "parallel", "arbitrary"),
            vmem_limit_bytes=_VMEM_LIMIT),
        cost_estimate=cost,
    )(p, wp, bp)

    if keep_cout_pad:
        return y[:M]           # keep 128-padded channels (feeds the SE kernel)
    return y[:M, :Cout]


def se_residual_proj(out2, xs, wsc, bsc, fc1w, fc1b, fc2w, fc2b):
    N, HW, Cp = out2.shape
    Cin_p = xs.shape[2]
    C16p = fc1w.shape[1]
    kernel = functools.partial(_se_residual_proj_kernel, inv_hw=1.0 / HW)
    cost = pl.CostEstimate(
        flops=2 * N * HW * Cin_p * Cp + 4 * N * Cp * C16p + 4 * N * HW * Cp,
        transcendentals=N * Cp,
        bytes_accessed=2 * N * HW * (Cp + Cin_p) + 4 * N * HW * Cp
        + 2 * (Cin_p * Cp + Cp * C16p + C16p * Cp),
    )
    return pl.pallas_call(
        kernel,
        out_shape=jax.ShapeDtypeStruct((N, HW, Cp), jnp.float32),
        grid=(N,),
        in_specs=[
            pl.BlockSpec((1, HW, Cp), lambda n: (n, 0, 0)),
            pl.BlockSpec((1, HW, Cin_p), lambda n: (n, 0, 0)),
            pl.BlockSpec((Cin_p, Cp), lambda n: (0, 0)),
            pl.BlockSpec((1, Cp), lambda n: (0, 0)),
            pl.BlockSpec((Cp, C16p), lambda n: (0, 0)),
            pl.BlockSpec((1, C16p), lambda n: (0, 0)),
            pl.BlockSpec((C16p, Cp), lambda n: (0, 0)),
            pl.BlockSpec((1, Cp), lambda n: (0, 0)),
        ],
        out_specs=pl.BlockSpec((1, HW, Cp), lambda n: (n, 0, 0)),
        compiler_params=pltpu.CompilerParams(
            dimension_semantics=("parallel",),
            vmem_limit_bytes=_VMEM_LIMIT),
        cost_estimate=cost,
    )(out2, xs, wsc, bsc, fc1w, fc1b, fc2w, fc2b)


def se_residual_identity(out2, sc, fc1w, fc1b, fc2w, fc2b):
    N, HW, Cp = out2.shape
    C16p = fc1w.shape[1]
    kernel = functools.partial(_se_residual_id_kernel, inv_hw=1.0 / HW)
    cost = pl.CostEstimate(
        flops=4 * N * Cp * C16p + 4 * N * HW * Cp,
        transcendentals=N * Cp,
        bytes_accessed=4 * N * HW * Cp + 4 * N * HW * Cp
        + 2 * (Cp * C16p + C16p * Cp),
    )
    return pl.pallas_call(
        kernel,
        out_shape=jax.ShapeDtypeStruct((N, HW, Cp), jnp.float32),
        grid=(N,),
        in_specs=[
            pl.BlockSpec((1, HW, Cp), lambda n: (n, 0, 0)),
            pl.BlockSpec((1, HW, Cp), lambda n: (n, 0, 0)),
            pl.BlockSpec((Cp, C16p), lambda n: (0, 0)),
            pl.BlockSpec((1, C16p), lambda n: (0, 0)),
            pl.BlockSpec((C16p, Cp), lambda n: (0, 0)),
            pl.BlockSpec((1, Cp), lambda n: (0, 0)),
        ],
        out_specs=pl.BlockSpec((1, HW, Cp), lambda n: (n, 0, 0)),
        compiler_params=pltpu.CompilerParams(
            dimension_semantics=("parallel",),
            vmem_limit_bytes=_VMEM_LIMIT),
        cost_estimate=cost,
    )(out2, sc, fc1w, fc1b, fc2w, fc2b)


# ---------------------------------------------------------------------------
# Glue: im2col, weight layout conversion, BN folding, full block forward
# ---------------------------------------------------------------------------
def extract_patches_3x3(x, stride):
    """x: [N, H, W, C] NHWC (bf16) -> patches [N, Ho, Wo, 9*C], order (kh,kw,c)."""
    N, H, W, C = x.shape
    xp = jnp.pad(x, ((0, 0), (1, 1), (1, 1), (0, 0)))
    Ho = (H + 2 - 3) // stride + 1
    Wo = (W + 2 - 3) // stride + 1
    cols = []
    for kh in range(3):
        for kw in range(3):
            cols.append(xp[:, kh:kh + (Ho - 1) * stride + 1:stride,
                             kw:kw + (Wo - 1) * stride + 1:stride, :])
    return jnp.concatenate(cols, axis=-1), Ho, Wo


def conv3x3_weight_to_matrix(w_pt):
    """PyTorch [Cout, Cin, 3, 3] -> [9*Cin, Cout] matching (kh, kw, c) patches."""
    cout, cin = w_pt.shape[0], w_pt.shape[1]
    return jnp.transpose(w_pt, (2, 3, 1, 0)).reshape(9 * cin, cout)


def fold_bn_into_weight(w_mat, gamma, beta, mean, var, eps=1e-5):
    """Fold inference-mode BN scale into weight columns; return (bf16 W, f32 bias)."""
    scale = gamma / jnp.sqrt(var + eps)
    bias = beta - mean * scale
    return (w_mat * scale[None, :]).astype(jnp.bfloat16), bias.astype(jnp.float32)


def basic_block_forward(x_nchw, params, *, stride):
    x = jnp.transpose(x_nchw, (0, 2, 3, 1)).astype(jnp.float32)   # NHWC
    N, H, W, Cin = x.shape
    planes = params["conv1_w"].shape[0]
    c16 = planes // 16
    x_bf = x.astype(jnp.bfloat16)

    # --- conv1 -> bn1 -> relu (BN scale folded into weight) ------------------
    w1, b1 = fold_bn_into_weight(conv3x3_weight_to_matrix(params["conv1_w"]),
                                 *params["bn1"])
    p1, H1, W1 = extract_patches_3x3(x_bf, stride)
    a1 = matmul_bias_act(p1.reshape(N * H1 * W1, -1), w1, b1, apply_relu=True)
    a1 = a1.reshape(N, H1, W1, planes)

    # --- conv2 -> bn2 (channels kept 128-padded for the SE kernel) -----------
    w2, b2 = fold_bn_into_weight(conv3x3_weight_to_matrix(params["conv2_w"]),
                                 *params["bn2"])
    p2, H2, W2 = extract_patches_3x3(a1, 1)
    out2 = matmul_bias_act(p2.reshape(N * H2 * W2, -1), w2, b2,
                           apply_relu=False, keep_cout_pad=True)
    Cp = out2.shape[1]
    HW = H2 * W2
    out2 = out2.reshape(N, HW, Cp)

    # --- SE weights, zero-padded to lane-dense shapes -------------------------
    C16p = _round_up(c16, 128)
    fc1w = jnp.transpose(params["fc1_w"].reshape(c16, planes))        # (planes, c16)
    fc1w = jnp.pad(fc1w.astype(jnp.bfloat16),
                   ((0, Cp - planes), (0, C16p - c16)))
    fc1b = jnp.pad(params["fc1_b"].astype(jnp.float32).reshape(1, c16),
                   ((0, 0), (0, C16p - c16)))
    fc2w = jnp.transpose(params["fc2_w"].reshape(planes, c16))        # (c16, planes)
    fc2w = jnp.pad(fc2w.astype(jnp.bfloat16),
                   ((0, C16p - c16), (0, Cp - planes)))
    fc2b = jnp.pad(params["fc2_b"].astype(jnp.float32).reshape(1, planes),
                   ((0, 0), (0, Cp - planes)))

    # --- SE gate + residual + relu (shortcut matmul fused when projecting) ---
    if stride != 1 or Cin != planes:
        wsc = jnp.transpose(params["sc_w"].reshape(planes, Cin))      # (Cin, planes)
        wsc, bsc = fold_bn_into_weight(wsc, *params["sc_bn"])
        Cin_p = _round_up(Cin, 128)
        wsc = jnp.pad(wsc, ((0, Cin_p - Cin), (0, Cp - planes)))
        bsc = jnp.pad(bsc.reshape(1, planes), ((0, 0), (0, Cp - planes)))
        xs = x_bf[:, ::stride, ::stride, :].reshape(N, HW, Cin)
        xs = jnp.pad(xs, ((0, 0), (0, 0), (0, Cin_p - Cin)))
        out = se_residual_proj(out2, xs, wsc, bsc, fc1w, fc1b, fc2w, fc2b)
    else:
        sc = jnp.pad(x_bf.reshape(N, HW, Cin), ((0, 0), (0, 0), (0, Cp - Cin)))
        out = se_residual_identity(out2, sc, fc1w, fc1b, fc2w, fc2b)

    out = out[:, :, :planes].reshape(N, H2, W2, planes)
    return jnp.transpose(out, (0, 3, 1, 2))   # back to NCHW


# ---------------------------------------------------------------------------
# Deterministic parameter construction (matches nn.Module shapes)
# ---------------------------------------------------------------------------
def make_params(key, in_planes, planes):
    ks = jax.random.split(key, 12)
    c16 = planes // 16

    def bn(k):
        k0, k1, k2, k3 = jax.random.split(k, 4)
        gamma = 1.0 + 0.1 * jax.random.normal(k0, (planes,), jnp.float32)
        beta = 0.1 * jax.random.normal(k1, (planes,), jnp.float32)
        mean = 0.1 * jax.random.normal(k2, (planes,), jnp.float32)
        var = 1.0 + 0.2 * jax.random.uniform(k3, (planes,), jnp.float32)
        return gamma, beta, mean, var

    return {
        "conv1_w": 0.1 * jax.random.normal(ks[0], (planes, in_planes, 3, 3), jnp.float32),
        "bn1": bn(ks[1]),
        "conv2_w": 0.1 * jax.random.normal(ks[2], (planes, planes, 3, 3), jnp.float32),
        "bn2": bn(ks[3]),
        "sc_w": 0.1 * jax.random.normal(ks[4], (planes, in_planes, 1, 1), jnp.float32),
        "sc_bn": bn(ks[5]),
        "fc1_w": 0.1 * jax.random.normal(ks[6], (c16, planes, 1, 1), jnp.float32),
        "fc1_b": 0.1 * jax.random.normal(ks[7], (c16,), jnp.float32),
        "fc2_w": 0.1 * jax.random.normal(ks[8], (planes, c16, 1, 1), jnp.float32),
        "fc2_b": 0.1 * jax.random.normal(ks[9], (planes,), jnp.float32),
    }


if __name__ == "__main__":
    in_planes, planes, stride = 16, 32, 2   # planes // 16 must be >= 1
    N, H, W = 2, 16, 16

    key = jax.random.PRNGKey(0)
    k_x, k_p = jax.random.split(key)
    x = jax.random.normal(k_x, (N, in_planes, H, W), jnp.float32)   # NCHW like PyTorch
    params = make_params(k_p, in_planes, planes)

    out = basic_block_forward(x, params, stride=stride)
    out = jax.block_until_ready(out)
    assert out.shape == (N, planes, H // stride, W // stride)
    assert bool(jnp.all(jnp.isfinite(out)))
    print("KERNEL_OK")
</pallas_src>

<mosaic_0001>
module attributes {stable_mosaic.version = 11 : i64} {
  func.func @_matmul_bias_act_kernel(%arg0: i32, %arg1: i32, %arg2: i32, %arg3: memref<128x256xbf16, #tpu.memory_space<vmem>>, %arg4: memref<256x128xbf16, #tpu.memory_space<vmem>>, %arg5: memref<1x128xf32, #tpu.memory_space<vmem>>, %arg6: memref<128x128xbf16, #tpu.memory_space<vmem>>, %arg7: memref<128x128xf32, #tpu.memory_space<vmem>>) attributes {dimension_semantics = [#tpu.dimension_semantics<parallel>, #tpu.dimension_semantics<parallel>, #tpu.dimension_semantics<arbitrary>], iteration_bounds = array<i64: 1, 1, 1>, scalar_prefetch = 0 : i64, scratch_operands = 1 : i64, tpu.core_type = #tpu.core_type<tc>, window_params = [{transform_indices = @transform_0, window_bounds = array<i64: 128, 256>}, {transform_indices = @transform_1, window_bounds = array<i64: 256, 128>}, {transform_indices = @transform_2, window_bounds = array<i64: 1, 128>}, {transform_indices = @transform_3, window_bounds = array<i64: 128, 128>}]} {
    %c0_i32 = arith.constant 0 : i32
    %0 = arith.cmpi eq, %arg2, %c0_i32 : i32
    %1 = arith.extui %0 : i1 to i32
    %c0_i32_0 = arith.constant 0 : i32
    %2 = arith.cmpi ne, %1, %c0_i32_0 : i32
    scf.if %2 {
      %cst_10 = arith.constant 0.000000e+00 : f32
      %12 = vector.broadcast %cst_10 : f32 to vector<128x128xf32>
      %c0_11 = arith.constant 0 : index
      %c0_12 = arith.constant 0 : index
      %13 = vector.load %arg7[%c0_11, %c0_12] : memref<128x128xf32, #tpu.memory_space<vmem>>, vector<128x128xf32>
      tpu.vector_store %arg7[%c0_11, %c0_12], %12 {strides = array<i32>} : memref<128x128xf32, #tpu.memory_space<vmem>>, vector<128x128xf32>,
    } else {
    }
    %c0 = arith.constant 0 : index
    %c0_1 = arith.constant 0 : index
    %3 = vector.load %arg7[%c0, %c0_1] : memref<128x128xf32, #tpu.memory_space<vmem>>, vector<128x128xf32>
    %c0_2 = arith.constant 0 : index
    %c0_3 = arith.constant 0 : index
    %4 = vector.load %arg3[%c0_2, %c0_3] : memref<128x256xbf16, #tpu.memory_space<vmem>>, vector<128x256xbf16>
    %c0_4 = arith.constant 0 : index
    %c0_5 = arith.constant 0 : index
    %5 = vector.load %arg4[%c0_4, %c0_5] : memref<256x128xbf16, #tpu.memory_space<vmem>>, vector<256x128xbf16>
    %cst = arith.constant dense<0.000000e+00> : vector<128x128xf32>
    %6 = tpu.matmul %4, %5, %cst {dimension_numbers = #tpu.dot_dimension_numbers<[1], [0], [0], [1], [0, 0, 1, 1], [], []>} : vector<128x256xbf16>, vector<256x128xbf16>, vector<128x128xf32> -> vector<128x128xf32>
    %7 = arith.addf %3, %6 : vector<128x128xf32>
    %c0_6 = arith.constant 0 : index
    %c0_7 = arith.constant 0 : index
    %8 = vector.load %arg7[%c0_6, %c0_7] : memref<128x128xf32, #tpu.memory_space<vmem>>, vector<128x128xf32>
    tpu.vector_store %arg7[%c0_6, %c0_7], %7 {strides = array<i32>} : memref<128x128xf32, #tpu.memory_space<vmem>>, vector<128x128xf32>,
    %c0_i32_8 = arith.constant 0 : i32
    %9 = arith.cmpi eq, %arg2, %c0_i32_8 : i32
    %10 = arith.extui %9 : i1 to i32
    %c0_i32_9 = arith.constant 0 : i32
    %11 = arith.cmpi ne, %10, %c0_i32_9 : i32
    scf.if %11 {
      %c0_10 = arith.constant 0 : index
      %c0_11 = arith.constant 0 : index
      %12 = vector.load %arg7[%c0_10, %c0_11] : memref<128x128xf32, #tpu.memory_space<vmem>>, vector<128x128xf32>
      %c0_12 = arith.constant 0 : index
      %c0_13 = arith.constant 0 : index
      %13 = vector.load %arg5[%c0_12, %c0_13] : memref<1x128xf32, #tpu.memory_space<vmem>>, vector<1x128xf32>
      %14 = vector.broadcast %13 : vector<1x128xf32> to vector<128x128xf32>
      %15 = arith.addf %12, %14 : vector<128x128xf32>
      %cst_14 = arith.constant 0.000000e+00 : f32
      %16 = vector.broadcast %cst_14 : f32 to vector<128x128xf32>
      %17 = arith.maximumf %15, %16 : vector<128x128xf32>
      %18 = arith.truncf %17 : vector<128x128xf32> to vector<128x128xbf16>
      %c0_15 = arith.constant 0 : index
      %c0_16 = arith.constant 0 : index
      %19 = vector.load %arg6[%c0_15, %c0_16] : memref<128x128xbf16, #tpu.memory_space<vmem>>, vector<128x128xbf16>
      tpu.vector_store %arg6[%c0_15, %c0_16], %18 {strides = array<i32>} : memref<128x128xbf16, #tpu.memory_space<vmem>>, vector<128x128xbf16>,
    } else {
    }
    return
  }
  func.func @transform_0(%arg0: i32, %arg1: i32, %arg2: i32) -> (i32, i32) {
    %c0_i32 = arith.constant 0 : i32
    return %arg0, %arg2 : i32, i32
  }
  func.func @transform_1(%arg0: i32, %arg1: i32, %arg2: i32) -> (i32, i32) {
    %c0_i32 = arith.constant 0 : i32
    return %arg2, %arg1 : i32, i32
  }
  func.func @transform_2(%arg0: i32, %arg1: i32, %arg2: i32) -> (i32, i32) {
    %c0_i32 = arith.constant 0 : i32
    %c0_i32_0 = arith.constant 0 : i32
    return %c0_i32, %arg1 : i32, i32
  }
  func.func @transform_3(%arg0: i32, %arg1: i32, %arg2: i32) -> (i32, i32) {
    %c0_i32 = arith.constant 0 : i32
    return %arg0, %arg1 : i32, i32
  }
}

</mosaic_0001>

<bundles_post_ra>
// kernel: tpu_custom_call.1
= control target key start
LH: loop header
LB: loop body
LE: loop exit
PB: predicated region body
PF: predicated region fallthrough
CT: control target
= control target key end

     0   :  { %8 = vsyncpa [#allocation4], 0  ;;  %s957_s0 = inlined_call_operand.hbm [shape: bf16[128,256], index: 0, kind: input, shape index: {}]   ;;  %s958_s1 = inlined_call_operand.hbm [shape: bf16[256,128], index: 1, kind: input, shape index: {}]   ;;  %s959_s2 = inlined_call_operand.vmem [shape: f32[1,128], index: 2, kind: input, shape index: {}]   ;;  %s960_s3 = inlined_call_operand.hbm [shape: bf16[128,128], index: 3, kind: output, shape index: {}]  }
   0x1   :  { %9 = vsyncpa [#allocation7], 0 }
   0x2   :  { %10 = vsyncpa [#allocation5], 0  ;;  %s894_s12 = smov [#allocation3]  }
   0x3   :  { %s16_s13 = sshll.u32 %s894_s12, 4  ;;  %s17_s13 = int_to_ptr.vmem [resolvable:$true] %s16_s13 }
   0x4   :  { %s836_s14 = scalar_lea.vmem %s17_s13, 2048  ;;  %p841_p1 = scmp.lt.s32.totalorder %s17_s13, %s17_s13 }
   0x5   :  { %p837_p0 = scmp.ne.s32.totalorder %s17_s13, %s836_s14  ;;  %p842_p2 = scmp.lt.s32.totalorder %s836_s14, %s836_s14 }
   0x7   :  { %p843_p3 = por %p842_p2, %p841_p1 }
   0x9   :  { %p844_p4 = pnand %p843_p3, %p837_p0 }
   0xb   :  { %847 = shalt.err (!%p844_p4)
}
   0xc   :  { %s895_s15 = smov 128   ;;  %s896_s16 = smov 8  }
   0xd   :  { %22 = dma.hbm_to_vmem [thread:$0]  %s957_s0, 2048, %s17_s13, [#allocation4], %s895_s15, %s895_s15, %s896_s16  }
   0xe   :  { %s897_s19 = smov [#allocation6]  }
   0xf   :  { %s28_s20 = sshll.u32 %s897_s19, 4  ;;  %s29_s20 = int_to_ptr.vmem [resolvable:$true] %s28_s20 }
  0x10   :  { %s856_s21 = scalar_lea.vmem %s29_s20, 2048  ;;  %p861_p6 = scmp.lt.s32.totalorder %s29_s20, %s29_s20 }
  0x11   :  { %p857_p5 = scmp.ne.s32.totalorder %s29_s20, %s856_s21  ;;  %p862_p7 = scmp.lt.s32.totalorder %s856_s21, %s856_s21 }
  0x13   :  { %p863_p8 = por %p862_p7, %p861_p6 }
  0x15   :  { %p864_p9 = pnand %p863_p8, %p857_p5 }
  0x17   :  { %867 = shalt.err (!%p864_p9)
}
  0x18   :  { %s898_s22 = smov 64   ;;  %s899_s23 = smov 4  }
  0x19   :  { %34 = dma.hbm_to_vmem [thread:$0]  %s958_s1, 2048, %s29_s20, [#allocation7], %s898_s22, %s898_s22, %s899_s23  }
  0x1a   :  { %888 = dma.done.wait [#allocation4], 2048  }
  0x1b   :  { %889 = vsyncadd [#allocation4], 4294965248 }
  0x1c   :  { %890 = dma.done.wait [#allocation7], 2048  }
  0x1d   :  { %891 = vsyncadd [#allocation7], 4294965248  ;;  %v788_v0 = vld [vmem:[#allocation6 + $0x78] sm:$0xff]   ;;  %v790_v2 = vld [vmem:[#allocation6 + $0x70] sm:$0xff]  }
  0x1e   :  { %v789_v1 = vld [vmem:[#allocation6 + $0x38] sm:$0xff]   ;;  %701 = vmatprep.subr.bf16.mxu0 %v788_v0  ;;  %765 = vmatprep.subr.bf16.mxu1 %v788_v0  ;;  %v791_v3 = vld [vmem:[#allocation6 + $0x30] sm:$0xff]   ;;  %v792_v4 = vld [vmem:[#allocation6 + $0x68] sm:$0xff]  }
  0x1f   :  { %702 = vmatpush3.bf16.msra.mxu0 %v789_v1  ;;  %773 = vmatpush3.bf16.msra.mxu1 %v789_v1  ;;  %v793_v5 = vld [vmem:[#allocation6 + $0x28] sm:$0xff]   ;;  %v794_v6 = vld [vmem:[#allocation6 + $0x60] sm:$0xff]   ;;  %v796_v8 = vld [vmem:[#allocation6 + $0x58] sm:$0xff]  }
  0x20   :  { %703 = vmatprep.subr.bf16.mxu0 %v790_v2  ;;  %766 = vmatprep.subr.bf16.mxu1 %v790_v2  ;;  %v795_v7 = vld [vmem:[#allocation6 + $0x20] sm:$0xff]   ;;  %v797_v9 = vld [vmem:[#allocation6 + $0x18] sm:$0xff]   ;;  %v798_v10 = vld [vmem:[#allocation6 + $0x50] sm:$0xff]  }
  0x21   :  { %v806_v11 = vld [vmem:[#allocation3 + $0x4] ss:$8 sps:$4 sm:$0xff]   ;;  %v799_v13 = vld [vmem:[#allocation6 + $0x10] sm:$0xff]   ;;  %v804_v18 = vld [vmem:[#allocation3] ss:$8 sps:$4 sm:$0xff]  }
  0x22   :  { %v809_v12 = vld [vmem:[#allocation3 + $0x44] ss:$8 sps:$4 sm:$0xff]   ;;  %336 = vmatprep.mubr.bf16.mxu0 %v806_v11  ;;  %v807_v19 = vld [vmem:[#allocation3 + $0x40] ss:$8 sps:$4 sm:$0xff]   ;;  %v810_v20 = vld [vmem:[#allocation3 + $0x14] ss:$8 sps:$4 sm:$0xff]  }
  0x23   :  { %704 = vmatpush3.bf16.msra.mxu0 %v791_v3  ;;  %774 = vmatpush3.bf16.msra.mxu1 %v791_v3  ;;  %v800_v14 = vld [vmem:[#allocation6 + $0x48] sm:$0xff]   ;;  %v802_v16 = vld [vmem:[#allocation6 + $0x40] sm:$0xff]   ;;  %v812_v21 = vld [vmem:[#allocation3 + $0x54] ss:$8 sps:$4 sm:$0xff]  }
  0x24   :  { %705 = vmatprep.subr.bf16.mxu0 %v792_v4  ;;  %767 = vmatprep.subr.bf16.mxu1 %v792_v4  ;;  %v801_v15 = vld [vmem:[#allocation6 + $0x8] sm:$0xff]   ;;  %v803_v17 = vld [vmem:[#allocation6] sm:$0xff]   ;;  %v814_v22 = vld [vmem:[#allocation3 + $0x10] ss:$8 sps:$4 sm:$0xff]  }
  0x25   :  { %368 = vmatprep.mubr.bf16.mxu1 %v809_v12  ;;  %v815_v23 = vld [vmem:[#allocation3 + $0x50] ss:$8 sps:$4 sm:$0xff]   ;;  %v816_v24 = vld [vmem:[#allocation3 + $0x24] ss:$8 sps:$4 sm:$0xff]   ;;  %v820_v26 = vld [vmem:[#allocation3 + $0x20] ss:$8 sps:$4 sm:$0xff]  }
  0x26   :  { %v818_v25 = vld [vmem:[#allocation3 + $0x64] ss:$8 sps:$4 sm:$0xff]   ;;  %v821_v27 = vld [vmem:[#allocation3 + $0x60] ss:$8 sps:$4 sm:$0xff]   ;;  %v822_v28 = vld [vmem:[#allocation3 + $0x34] ss:$8 sps:$4 sm:$0xff]  }
  0x27   :  { %706 = vmatpush3.bf16.msra.mxu0 %v793_v5  ;;  %775 = vmatpush3.bf16.msra.mxu1 %v793_v5  ;;  %v824_v29 = vld [vmem:[#allocation3 + $0x74] ss:$8 sps:$4 sm:$0xff]   ;;  %v826_v30 = vld [vmem:[#allocation3 + $0x30] ss:$8 sps:$4 sm:$0xff]   ;;  %v933_v37 = vld [vmem:[%s959_s2] ss:$0 sm:$0xff] }
  0x28   :  { %707 = vmatprep.subr.bf16.mxu0 %v794_v6  ;;  %768 = vmatprep.subr.bf16.mxu1 %v794_v6  ;;  %v827_v31 = vld [vmem:[#allocation3 + $0x70] ss:$8 sps:$4 sm:$0xff]   ;;  %s900_s2 = smov [#allocation8]  }
  0x29   :  { %s576_s26 = sshll.u32 %s900_s2, 4  ;;  %s577_s26 = int_to_ptr.vmem [resolvable:$true] %s576_s26 }
  0x2a   :  { %s868_s27 = scalar_lea.vmem %s577_s26, 1024  ;;  %p873_p11 = scmp.lt.s32.totalorder %s577_s26, %s577_s26 }
  0x2b   :  { %708 = vmatpush3.bf16.msra.mxu0 %v795_v7  ;;  %776 = vmatpush3.bf16.msra.mxu1 %v795_v7  ;;  %p869_p10 = scmp.ne.s32.totalorder %s577_s26, %s868_s27  ;;  %p874_p12 = scmp.lt.s32.totalorder %s868_s27, %s868_s27 }
  0x2c   :  { %709 = vmatprep.subr.bf16.mxu0 %v796_v8  ;;  %769 = vmatprep.subr.bf16.mxu1 %v796_v8 }
  0x2d   :  { %p875_p13 = por %p874_p12, %p873_p11 }
  0x2f   :  { %710 = vmatpush3.bf16.msra.mxu0 %v797_v9  ;;  %777 = vmatpush3.bf16.msra.mxu1 %v797_v9  ;;  %p876_p0 = pnand %p875_p13, %p869_p10 }
  0x30   :  { %711 = vmatprep.subr.bf16.mxu0 %v798_v10  ;;  %770 = vmatprep.subr.bf16.mxu1 %v798_v10 }
  0x33   :  { %712 = vmatpush3.bf16.msra.mxu0 %v799_v13  ;;  %778 = vmatpush3.bf16.msra.mxu1 %v799_v13 }
  0x34   :  { %713 = vmatprep.subr.bf16.mxu0 %v800_v14  ;;  %771 = vmatprep.subr.bf16.mxu1 %v800_v14 }
  0x37   :  { %714 = vmatpush3.bf16.msra.mxu0 %v801_v15  ;;  %779 = vmatpush3.bf16.msra.mxu1 %v801_v15 }
  0x38   :  { %715 = vmatprep.subr.bf16.mxu0 %v802_v16  ;;  %772 = vmatprep.subr.bf16.mxu1 %v802_v16 }
  0x3b   :  { %716 = vmatpush3.bf16.msra.mxu0 %v803_v17  ;;  %780 = vmatpush3.bf16.msra.mxu1 %v803_v17 }
  0x3e   :  { %337 = vmatmul.mubr.bf16.vlgmr.msra.gmra.mxu0 %v804_v18  ;;  %369 = vmatmul.mubr.bf16.vlgmr.msra.gmra.mxu1 %v807_v19 }
  0x3f   :  { %344 = vmatprep.mubr.bf16.mxu0 %v810_v20  ;;  %376 = vmatprep.mubr.bf16.mxu1 %v812_v21 }
  0x46   :  { %345 = vmatmul.mubr.bf16.gmra.mxu0 %v814_v22  ;;  %377 = vmatmul.mubr.bf16.gmra.mxu1 %v815_v23 }
  0x47   :  { %352 = vmatprep.mubr.bf16.mxu0 %v816_v24  ;;  %384 = vmatprep.mubr.bf16.mxu1 %v818_v25 }
  0x4e   :  { %353 = vmatmul.mubr.bf16.gmra.mxu0 %v820_v26  ;;  %385 = vmatmul.mubr.bf16.gmra.mxu1 %v821_v27 }
  0x4f   :  { %360 = vmatprep.mubr.bf16.mxu0 %v822_v28  ;;  %392 = vmatprep.mubr.bf16.mxu1 %v824_v29 }
  0x56   :  { %361 = vmatmul.mubr.bf16.gmra.mxu0 %v826_v30  ;;  %393 = vmatmul.mubr.bf16.gmra.mxu1 %v827_v31 }
  0xfe   :  { %v717_v32 = vpop.f32.mrf.mxu0  ;;  %v741_v33 = vpop.f32.mrf.mxu1 }
 0x100   :  { %v718_v34 = vpop.f32.mrf.mxu0  ;;  %v742_v35 = vpop.f32.mrf.mxu1 }
 0x101   :  { %v719_v36 = vadd.f32 %v718_v34, %v717_v32  ;;  %v743_v38 = vadd.f32 %v742_v35, %v741_v33 }
 0x102   :  { %v720_v39 = vpop.f32.mrf.mxu0  ;;  %v744_v40 = vpop.f32.mrf.mxu1 }
 0x103   :  { %v459_v41 = vadd.f32 %v719_v36, %v933_v37  ;;  %v467_v42 = vadd.f32 %v743_v38, %v933_v37 }
 0x104   :  { %v721_v43 = vpop.f32.mrf.mxu0  ;;  %v745_v44 = vpop.f32.mrf.mxu1 }
 0x105   :  { %v722_v45 = vadd.f32 %v721_v43, %v720_v39  ;;  %v746_v46 = vadd.f32 %v745_v44, %v744_v40  ;;  %v475_v51 = vmax.f32 %v459_v41, 0.0  ;;  %v483_v52 = vmax.f32 %v467_v42, 0.0 }
 0x106   :  { %v723_v47 = vpop.f32.mrf.mxu0  ;;  %v747_v48 = vpop.f32.mrf.mxu1 }
 0x107   :  { %v460_v49 = vadd.f32 %v722_v45, %v933_v37  ;;  %v468_v50 = vadd.f32 %v746_v46, %v933_v37 }
 0x108   :  { %v724_v53 = vpop.f32.mrf.mxu0  ;;  %v748_v54 = vpop.f32.mrf.mxu1 }
 0x109   :  { %v476_v55 = vmax.f32 %v460_v49, 0.0  ;;  %v484_v56 = vmax.f32 %v468_v50, 0.0  ;;  %v725_v57 = vadd.f32 %v724_v53, %v723_v47  ;;  %v749_v58 = vadd.f32 %v748_v54, %v747_v48 }
 0x10a   :  { %v726_v59 = vpop.f32.mrf.mxu0  ;;  %v750_v60 = vpop.f32.mrf.mxu1 }
 0x10b   :  { %v657_v61 = vpack.c.bf16 %v476_v55, %v475_v51  ;;  %v677_v62 = vpack.c.bf16 %v484_v56, %v483_v52  ;;  %v461_v63 = vadd.f32 %v725_v57, %v933_v37  ;;  %v469_v0 = vadd.f32 %v749_v58, %v933_v37 }
 0x10c   :  { %v727_v1 = vpop.f32.mrf.mxu0  ;;  %v751_v2 = vpop.f32.mrf.mxu1 }
 0x10d   :  { %658 = vst [vmem:[#allocation8] sm:$0xff] %v657_v61   ;;  %697 = vst [vmem:[#allocation8 + $0x20] sm:$0xff] %v677_v62   ;;  %v728_v3 = vadd.f32 %v727_v1, %v726_v59  ;;  %v752_v4 = vadd.f32 %v751_v2, %v750_v60  ;;  %v477_v9 = vmax.f32 %v461_v63, 0.0  ;;  %v485_v10 = vmax.f32 %v469_v0, 0.0 }
 0x10e   :  { %v729_v5 = vpop.f32.mrf.mxu0  ;;  %v753_v6 = vpop.f32.mrf.mxu1 }
 0x10f   :  { %v462_v7 = vadd.f32 %v728_v3, %v933_v37  ;;  %v470_v8 = vadd.f32 %v752_v4, %v933_v37 }
 0x110   :  { %v730_v11 = vpop.f32.mrf.mxu0  ;;  %v754_v12 = vpop.f32.mrf.mxu1 }
 0x111   :  { %v478_v13 = vmax.f32 %v462_v7, 0.0  ;;  %v486_v14 = vmax.f32 %v470_v8, 0.0  ;;  %v731_v15 = vadd.f32 %v730_v11, %v729_v5  ;;  %v755_v16 = vadd.f32 %v754_v12, %v753_v6 }
 0x112   :  { %v732_v17 = vpop.f32.mrf.mxu0  ;;  %v756_v18 = vpop.f32.mrf.mxu1 }
 0x113   :  { %v662_v19 = vpack.c.bf16 %v478_v13, %v477_v9  ;;  %v682_v20 = vpack.c.bf16 %v486_v14, %v485_v10  ;;  %v463_v21 = vadd.f32 %v731_v15, %v933_v37  ;;  %v471_v22 = vadd.f32 %v755_v16, %v933_v37 }
 0x114   :  { %v733_v23 = vpop.f32.mrf.mxu0  ;;  %v757_v24 = vpop.f32.mrf.mxu1 }
 0x115   :  { %694 = vst [vmem:[#allocation8 + $0x8] sm:$0xff] %v662_v19   ;;  %698 = vst [vmem:[#allocation8 + $0x28] sm:$0xff] %v682_v20   ;;  %v734_v25 = vadd.f32 %v733_v23, %v732_v17  ;;  %v758_v26 = vadd.f32 %v757_v24, %v756_v18  ;;  %v479_v31 = vmax.f32 %v463_v21, 0.0  ;;  %v487_v32 = vmax.f32 %v471_v22, 0.0 }
 0x116   :  { %v735_v27 = vpop.f32.mrf.mxu0  ;;  %v759_v28 = vpop.f32.mrf.mxu1 }
 0x117   :  { %v464_v29 = vadd.f32 %v734_v25, %v933_v37  ;;  %v472_v30 = vadd.f32 %v758_v26, %v933_v37 }
 0x118   :  { %v736_v33 = vpop.f32.mrf.mxu0  ;;  %v760_v34 = vpop.f32.mrf.mxu1 }
 0x119   :  { %v480_v35 = vmax.f32 %v464_v29, 0.0  ;;  %v488_v36 = vmax.f32 %v472_v30, 0.0  ;;  %v737_v38 = vadd.f32 %v736_v33, %v735_v27  ;;  %v761_v39 = vadd.f32 %v760_v34, %v759_v28 }
 0x11a   :  { %v738_v40 = vpop.f32.mrf.mxu0  ;;  %v762_v41 = vpop.f32.mrf.mxu1 }
 0x11b   :  { %v667_v42 = vpack.c.bf16 %v480_v35, %v479_v31  ;;  %v687_v43 = vpack.c.bf16 %v488_v36, %v487_v32  ;;  %v465_v46 = vadd.f32 %v737_v38, %v933_v37  ;;  %v473_v47 = vadd.f32 %v761_v39, %v933_v37 }
 0x11c   :  { %v739_v44 = vpop.f32.mrf.mxu0  ;;  %v763_v45 = vpop.f32.mrf.mxu1 }
 0x11d   :  { %695 = vst [vmem:[#allocation8 + $0x10] sm:$0xff] %v667_v42   ;;  %699 = vst [vmem:[#allocation8 + $0x30] sm:$0xff] %v687_v43   ;;  %v740_v48 = vadd.f32 %v739_v44, %v738_v40  ;;  %v764_v49 = vadd.f32 %v763_v45, %v762_v41  ;;  %v481_v52 = vmax.f32 %v465_v46, 0.0  ;;  %v489_v53 = vmax.f32 %v473_v47, 0.0 }
 0x11f   :  { %v466_v50 = vadd.f32 %v740_v48, %v933_v37  ;;  %v474_v51 = vadd.f32 %v764_v49, %v933_v37 }
 0x121   :  { %v482_v54 = vmax.f32 %v466_v50, 0.0  ;;  %v490_v55 = vmax.f32 %v474_v51, 0.0 }
 0x123   :  { %v672_v56 = vpack.c.bf16 %v482_v54, %v481_v52  ;;  %v692_v57 = vpack.c.bf16 %v490_v55, %v489_v53 }
 0x125   :  { %696 = vst [vmem:[#allocation8 + $0x18] sm:$0xff] %v672_v56   ;;  %700 = vst [vmem:[#allocation8 + $0x38] sm:$0xff] %v692_v57  }
 0x126   :  { %879 = shalt.err (!%p876_p0)
}
 0x127   :  { %582 = dma.vmem_to_hbm [thread:$0]  %s577_s26, 1024, %s960_s3, [#allocation5], %s898_s22, %s898_s22, %s899_s23  }
 0x128   :  { %892 = dma.done.wait [#allocation5], 1024  }
 0x129   :  { %893 = vsyncadd [#allocation5], 4294966272 }
 0x12a   :  { %586 = vsyncpa [#allocation4], 1 }
 0x12b   :  { %587 = vsyncpa [#allocation7], 1 }
 0x12c   :  { %588 = vsyncpa [#allocation5], 1 }

</bundles_post_ra>
